<compile_context>
chip_gen: v6e
topology: v6e:2x2x1
jax: 0.10.0
libtpu: 0.0.40
codegen_flags: <defaults>
</compile_context>

<pallas_src>
import random
from typing import Tuple

import numpy as np
import jax
import jax.numpy as jnp
from jax.experimental import pallas as pl
from jax.experimental.pallas import tpu as pltpu


# ---------------------------------------------------------------------------
# Pallas kernel: fused two-sided matmuls (images: bilinear, label: nearest)
# ---------------------------------------------------------------------------
def _fused_resize_kernel(my_lin_ref, mxt_lin_ref, my_nn_ref, mxt_nn_ref,
                         imgs_ref, tgt_ref, imgs_out_ref, tgt_out_ref):
    # imgs_ref : (C, H, W2) bf16  -- a and b concatenated along the lane axis
    # my_lin   : (H, H)  bf16     mxt_lin : (W2, W2) bf16 (block-diagonal)
    # tgt_ref  : (1, H, W) f32    my_nn/mxt_nn : (H,H)/(W,W) f32 0/1 selectors
    C, H, W2 = imgs_ref.shape

    # Right multiply: one lane-dense MXU matmul with M = C*H (fills MXU rows).
    flat = imgs_ref[...].reshape(C * H, W2)
    t = jnp.dot(flat, mxt_lin_ref[...], preferred_element_type=jnp.float32)
    t = t.reshape(C, H, W2).astype(jnp.bfloat16)

    # Left multiply: tiny static unroll over channels (C is small).
    my = my_lin_ref[...]
    for c in range(C):
        imgs_out_ref[c] = jnp.dot(my, t[c], preferred_element_type=jnp.float32)

    # Label map: nearest path stays in f32 -> exact (matrices are 0/1 selectors).
    tr = jnp.dot(tgt_ref[0], mxt_nn_ref[...], preferred_element_type=jnp.float32)
    tgt_out_ref[0] = jnp.dot(my_nn_ref[...], tr, preferred_element_type=jnp.float32)


def fused_resize_croppad(my_lin, mxt_lin2, my_nn, mxt_nn, imgs, tgt):
    """imgs: (C, H, W2) bf16, tgt: (1, H, W) f32 -> (imgs_out f32, tgt_out f32)."""
    C, H, W2 = imgs.shape
    _, _, W = tgt.shape
    vmem = pl.BlockSpec(memory_space=pltpu.MemorySpace.VMEM)
    # TODO(synk): for large images (>~1k px) the dense (H,H)/(W,W) fold matrices
    # should be tiled over H/W (grid + accumulator scratch) to stay within v7x's
    # 64 MiB VMEM; at 64x64 everything fits trivially.
    # TODO(synk): gridless single-block kernel runs on one TensorCore; re-add a
    # "parallel" channel grid axis for v7x if the image size grows enough for
    # compute to matter (launch overhead dominates at 64x64).
    return pl.pallas_call(
        _fused_resize_kernel,
        out_shape=(jax.ShapeDtypeStruct((C, H, W2), jnp.float32),
                   jax.ShapeDtypeStruct((1, H, W), jnp.float32)),
        in_specs=[vmem] * 6,
        out_specs=(vmem, vmem),
    )(my_lin, mxt_lin2, my_nn, mxt_nn, imgs, tgt)


# ---------------------------------------------------------------------------
# Jitted device-side glue (compiles once per image shape)
# ---------------------------------------------------------------------------
@jax.jit
def _apply_device(my_lin, mxt_lin2, my_nn, mxt_nn, a_img, b_img, target):
    H, W, C = a_img.shape
    a_chw = jnp.transpose(a_img.astype(jnp.float32), (2, 0, 1))
    b_chw = jnp.transpose(b_img.astype(jnp.float32), (2, 0, 1))
    imgs = jnp.concatenate([a_chw, b_chw], axis=2).astype(jnp.bfloat16)  # (C, H, 2W)
    tgt = target.astype(jnp.float32)[None]                               # (1, H, W)

    imgs_out, tgt_out = fused_resize_croppad(
        my_lin.astype(jnp.bfloat16), mxt_lin2.astype(jnp.bfloat16),
        my_nn.astype(jnp.float32), mxt_nn.astype(jnp.float32),
        imgs, tgt)

    a_out = jnp.transpose(imgs_out[:, :, :W], (1, 2, 0)).astype(a_img.dtype)
    b_out = jnp.transpose(imgs_out[:, :, W:], (1, 2, 0)).astype(b_img.dtype)
    t_out = jnp.round(tgt_out[0]).astype(target.dtype)
    return a_out, b_out, t_out


# ---------------------------------------------------------------------------
# Glue: build the resize / crop / pad matrices (deterministic, numpy)
# ---------------------------------------------------------------------------
def _bilinear_matrix(n_out: int, n_in: int) -> np.ndarray:
    """cv2 INTER_LINEAR style (half-pixel centers, edge clamp)."""
    i = np.arange(n_out)
    src = (i + 0.5) * (n_in / n_out) - 0.5
    i0 = np.floor(src).astype(np.int64)
    frac = (src - i0).astype(np.float32)
    i0c = np.clip(i0, 0, n_in - 1)
    i1c = np.clip(i0 + 1, 0, n_in - 1)
    m = np.zeros((n_out, n_in), np.float32)
    np.add.at(m, (i, i0c), 1.0 - frac)
    np.add.at(m, (i, i1c), frac)
    return m


def _nearest_matrix(n_out: int, n_in: int) -> np.ndarray:
    """cv2 INTER_NEAREST style (floor of scaled index)."""
    i = np.arange(n_out)
    src = np.clip(np.floor(i * (n_in / n_out)).astype(np.int64), 0, n_in - 1)
    m = np.zeros((n_out, n_in), np.float32)
    m[i, src] = 1.0
    return m


def _croppad_matrix(n_orig: int, n_new: int) -> np.ndarray:
    """Map resized axis (n_new) back to original (n_orig): center crop or zero pad."""
    m = np.zeros((n_orig, n_new), np.float32)
    if n_new >= n_orig:                      # center crop
        off = (n_new - n_orig) // 2
        m[np.arange(n_orig), np.arange(n_orig) + off] = 1.0
    else:                                    # constant (0) border pad
        off = (n_orig - n_new) // 2
        m[np.arange(n_new) + off, np.arange(n_new)] = 1.0
    return m


def _blockdiag2(m: np.ndarray) -> np.ndarray:
    n0, n1 = m.shape
    out = np.zeros((2 * n0, 2 * n1), m.dtype)
    out[:n0, :n1] = m
    out[n0:, n1:] = m
    return out


# ---------------------------------------------------------------------------
# Module equivalent
# ---------------------------------------------------------------------------
class RandomResizePallas:
    """JAX/Pallas port of RandomResize (随机缩放)."""

    def __init__(self, scale_range: Tuple[float, float] = (0.8, 1.2), prob: float = 0.5):
        self.scale_range = scale_range
        self.prob = prob

    def __call__(self, a_img, b_img, target):
        # a_img, b_img: (H, W, C) ; target: (H, W) label map
        # TODO(synk): the reference types `target` as a dict but then slices/pads it
        # like an array; we implement the (H, W) label-map interpretation.
        if random.random() < self.prob:
            scale = float(np.random.uniform(self.scale_range[0], self.scale_range[1]))
            img_h, img_w = int(a_img.shape[0]), int(a_img.shape[1])
            new_w, new_h = int(img_w * scale), int(img_h * scale)

            # fold resize + crop/pad into one matrix per axis
            cy = _croppad_matrix(img_h, new_h)
            cx = _croppad_matrix(img_w, new_w)
            my_lin = cy @ _bilinear_matrix(new_h, img_h)        # (H, H)
            mxt_lin = (cx @ _bilinear_matrix(new_w, img_w)).T   # (W, W), pre-transposed
            my_nn = cy @ _nearest_matrix(new_h, img_h)
            mxt_nn = (cx @ _nearest_matrix(new_w, img_w)).T

            a_img, b_img, target = _apply_device(
                jnp.asarray(my_lin), jnp.asarray(_blockdiag2(mxt_lin)),
                jnp.asarray(my_nn), jnp.asarray(mxt_nn),
                a_img, b_img, target)
            # TODO(synk): the reference's trailing `if a_img.shape[1:] != (img_h, img_w)`
            # re-resize is a no-op here since crop/pad already restores (img_h, img_w);
            # label padding uses value 0, matching the reference copyMakeBorder value=(0,).

        assert a_img.shape == b_img.shape, "图像尺寸不一致"
        return a_img, b_img, target


# ---------------------------------------------------------------------------
# Demo
# ---------------------------------------------------------------------------
if __name__ == "__main__":
    # deterministic host-side randomness (the module's random.random / np.random)
    random.seed(0)
    np.random.seed(0)

    key = jax.random.PRNGKey(0)
    k1, k2, k3 = jax.random.split(key, 3)
    H, W, C = 64, 64, 3
    a_img = jax.random.uniform(k1, (H, W, C), dtype=jnp.float32)
    b_img = jax.random.uniform(k2, (H, W, C), dtype=jnp.float32)
    target = jax.random.randint(k3, (H, W), 0, 5, dtype=jnp.int32)

    # --- kernel sanity check: identity fold matrices => (near-)identity output ---
    eye_h = jnp.eye(H, dtype=jnp.float32)
    eye_w = jnp.eye(W, dtype=jnp.float32)
    eye_2w = jnp.eye(2 * W, dtype=jnp.float32)
    a_id, b_id, t_id = _apply_device(eye_h, eye_2w, eye_h, eye_w, a_img, b_img, target)
    jax.block_until_ready((a_id, b_id, t_id))
    assert np.allclose(np.asarray(a_id), np.asarray(a_img), atol=1.5e-2)
    assert np.allclose(np.asarray(b_id), np.asarray(b_img), atol=1.5e-2)
    assert np.array_equal(np.asarray(t_id), np.asarray(target))

    # --- module path (random scale, prob=1.0) ---
    module = RandomResizePallas(scale_range=(0.8, 1.2), prob=1.0)
    a_out, b_out, t_out = module(a_img, b_img, target)
    jax.block_until_ready((a_out, b_out, t_out))

    assert a_out.shape == (H, W, C) and b_out.shape == (H, W, C) and t_out.shape == (H, W)
    assert a_out.dtype == a_img.dtype and t_out.dtype == target.dtype
    assert bool(jnp.all(jnp.isfinite(a_out))) and bool(jnp.all(jnp.isfinite(b_out)))
    print("KERNEL_OK")
</pallas_src>

<mosaic_0001>
module attributes {stable_mosaic.version = 11 : i64} {
  func.func @_fused_resize_kernel(%arg0: memref<64x64xbf16, #tpu.memory_space<vmem>>, %arg1: memref<128x128xbf16, #tpu.memory_space<vmem>>, %arg2: memref<64x64xf32, #tpu.memory_space<vmem>>, %arg3: memref<64x64xf32, #tpu.memory_space<vmem>>, %arg4: memref<3x64x128xbf16, #tpu.memory_space<vmem>>, %arg5: memref<1x64x64xf32, #tpu.memory_space<vmem>>, %arg6: memref<3x64x128xf32, #tpu.memory_space<vmem>>, %arg7: memref<1x64x64xf32, #tpu.memory_space<vmem>>) attributes {dimension_semantics = [], scalar_prefetch = 0 : i64, scratch_operands = 0 : i64, tpu.core_type = #tpu.core_type<tc>} {
    %c0 = arith.constant 0 : index
    %c0_0 = arith.constant 0 : index
    %c0_1 = arith.constant 0 : index
    %0 = vector.load %arg4[%c0, %c0_0, %c0_1] : memref<3x64x128xbf16, #tpu.memory_space<vmem>>, vector<3x64x128xbf16>
    %1 = vector.shape_cast %0 : vector<3x64x128xbf16> to vector<192x128xbf16>
    %c0_2 = arith.constant 0 : index
    %c0_3 = arith.constant 0 : index
    %2 = vector.load %arg1[%c0_2, %c0_3] : memref<128x128xbf16, #tpu.memory_space<vmem>>, vector<128x128xbf16>
    %cst = arith.constant dense<0.000000e+00> : vector<192x128xf32>
    %3 = tpu.matmul %1, %2, %cst {dimension_numbers = #tpu.dot_dimension_numbers<[1], [0], [0], [1], [0, 0, 1, 1], [], []>} : vector<192x128xbf16>, vector<128x128xbf16>, vector<192x128xf32> -> vector<192x128xf32>
    %4 = vector.shape_cast %3 : vector<192x128xf32> to vector<3x64x128xf32>
    %5 = arith.truncf %4 : vector<3x64x128xf32> to vector<3x64x128xbf16>
    %c0_4 = arith.constant 0 : index
    %c0_5 = arith.constant 0 : index
    %6 = vector.load %arg0[%c0_4, %c0_5] : memref<64x64xbf16, #tpu.memory_space<vmem>>, vector<64x64xbf16>
    %7 = vector.extract_strided_slice %5 {offsets = [0, 0, 0], sizes = [1, 64, 128], strides = [1, 1, 1]} : vector<3x64x128xbf16> to vector<1x64x128xbf16>
    %8 = vector.shape_cast %7 : vector<1x64x128xbf16> to vector<64x128xbf16>
    %cst_6 = arith.constant dense<0.000000e+00> : vector<64x128xf32>
    %9 = tpu.matmul %6, %8, %cst_6 {dimension_numbers = #tpu.dot_dimension_numbers<[1], [0], [0], [1], [0, 0, 1, 1], [], []>} : vector<64x64xbf16>, vector<64x128xbf16>, vector<64x128xf32> -> vector<64x128xf32>
    %c0_7 = arith.constant 0 : index
    %c0_8 = arith.constant 0 : index
    %c0_9 = arith.constant 0 : index
    %10 = vector.load %arg6[%c0_7, %c0_8, %c0_9] : memref<3x64x128xf32, #tpu.memory_space<vmem>>, vector<1x64x128xf32>
    %11 = vector.shape_cast %10 : vector<1x64x128xf32> to vector<64x128xf32>
    %12 = vector.shape_cast %9 : vector<64x128xf32> to vector<1x64x128xf32>
    tpu.vector_store %arg6[%c0_7, %c0_8, %c0_9], %12 {strides = array<i32>} : memref<3x64x128xf32, #tpu.memory_space<vmem>>, vector<1x64x128xf32>,
    %13 = vector.extract_strided_slice %5 {offsets = [1, 0, 0], sizes = [1, 64, 128], strides = [1, 1, 1]} : vector<3x64x128xbf16> to vector<1x64x128xbf16>
    %14 = vector.shape_cast %13 : vector<1x64x128xbf16> to vector<64x128xbf16>
    %cst_10 = arith.constant dense<0.000000e+00> : vector<64x128xf32>
    %15 = tpu.matmul %6, %14, %cst_10 {dimension_numbers = #tpu.dot_dimension_numbers<[1], [0], [0], [1], [0, 0, 1, 1], [], []>} : vector<64x64xbf16>, vector<64x128xbf16>, vector<64x128xf32> -> vector<64x128xf32>
    %c1 = arith.constant 1 : index
    %c0_11 = arith.constant 0 : index
    %c0_12 = arith.constant 0 : index
    %16 = vector.load %arg6[%c1, %c0_11, %c0_12] : memref<3x64x128xf32, #tpu.memory_space<vmem>>, vector<1x64x128xf32>
    %17 = vector.shape_cast %16 : vector<1x64x128xf32> to vector<64x128xf32>
    %18 = vector.shape_cast %15 : vector<64x128xf32> to vector<1x64x128xf32>
    tpu.vector_store %arg6[%c1, %c0_11, %c0_12], %18 {strides = array<i32>} : memref<3x64x128xf32, #tpu.memory_space<vmem>>, vector<1x64x128xf32>,
    %19 = vector.extract_strided_slice %5 {offsets = [2, 0, 0], sizes = [1, 64, 128], strides = [1, 1, 1]} : vector<3x64x128xbf16> to vector<1x64x128xbf16>
    %20 = vector.shape_cast %19 : vector<1x64x128xbf16> to vector<64x128xbf16>
    %cst_13 = arith.constant dense<0.000000e+00> : vector<64x128xf32>
    %21 = tpu.matmul %6, %20, %cst_13 {dimension_numbers = #tpu.dot_dimension_numbers<[1], [0], [0], [1], [0, 0, 1, 1], [], []>} : vector<64x64xbf16>, vector<64x128xbf16>, vector<64x128xf32> -> vector<64x128xf32>
    %c2 = arith.constant 2 : index
    %c0_14 = arith.constant 0 : index
    %c0_15 = arith.constant 0 : index
    %22 = vector.load %arg6[%c2, %c0_14, %c0_15] : memref<3x64x128xf32, #tpu.memory_space<vmem>>, vector<1x64x128xf32>
    %23 = vector.shape_cast %22 : vector<1x64x128xf32> to vector<64x128xf32>
    %24 = vector.shape_cast %21 : vector<64x128xf32> to vector<1x64x128xf32>
    tpu.vector_store %arg6[%c2, %c0_14, %c0_15], %24 {strides = array<i32>} : memref<3x64x128xf32, #tpu.memory_space<vmem>>, vector<1x64x128xf32>,
    %c0_16 = arith.constant 0 : index
    %c0_17 = arith.constant 0 : index
    %c0_18 = arith.constant 0 : index
    %25 = vector.load %arg5[%c0_16, %c0_17, %c0_18] : memref<1x64x64xf32, #tpu.memory_space<vmem>>, vector<1x64x64xf32>
    %26 = vector.shape_cast %25 : vector<1x64x64xf32> to vector<64x64xf32>
    %c0_19 = arith.constant 0 : index
    %c0_20 = arith.constant 0 : index
    %27 = vector.load %arg3[%c0_19, %c0_20] : memref<64x64xf32, #tpu.memory_space<vmem>>, vector<64x64xf32>
    %cst_21 = arith.constant dense<0.000000e+00> : vector<64x64xf32>
    %28 = tpu.matmul %26, %27, %cst_21 {dimension_numbers = #tpu.dot_dimension_numbers<[1], [0], [0], [1], [0, 0, 1, 1], [], []>} : vector<64x64xf32>, vector<64x64xf32>, vector<64x64xf32> -> vector<64x64xf32>
    %c0_22 = arith.constant 0 : index
    %c0_23 = arith.constant 0 : index
    %29 = vector.load %arg2[%c0_22, %c0_23] : memref<64x64xf32, #tpu.memory_space<vmem>>, vector<64x64xf32>
    %cst_24 = arith.constant dense<0.000000e+00> : vector<64x64xf32>
    %30 = tpu.matmul %29, %28, %cst_24 {dimension_numbers = #tpu.dot_dimension_numbers<[1], [0], [0], [1], [0, 0, 1, 1], [], []>} : vector<64x64xf32>, vector<64x64xf32>, vector<64x64xf32> -> vector<64x64xf32>
    %c0_25 = arith.constant 0 : index
    %c0_26 = arith.constant 0 : index
    %c0_27 = arith.constant 0 : index
    %31 = vector.load %arg7[%c0_25, %c0_26, %c0_27] : memref<1x64x64xf32, #tpu.memory_space<vmem>>, vector<1x64x64xf32>
    %32 = vector.shape_cast %31 : vector<1x64x64xf32> to vector<64x64xf32>
    %33 = vector.shape_cast %30 : vector<64x64xf32> to vector<1x64x64xf32>
    tpu.vector_store %arg7[%c0_25, %c0_26, %c0_27], %33 {strides = array<i32>} : memref<1x64x64xf32, #tpu.memory_space<vmem>>, vector<1x64x64xf32>,
    return
  }
}

</mosaic_0001>

<bundles_post_ra>
// kernel: _apply_device.1
= control target key start
LH: loop header
LB: loop body
LE: loop exit
PB: predicated region body
PF: predicated region fallthrough
CT: control target
= control target key end

     0   :  { %vm355_vm0 = vcmask 523264   ;;  %s1536_s1 = inlined_call_operand.vmem [shape: bf16[128,128], index: 1, kind: input, shape index: {}]   ;;  %s1537_s4 = inlined_call_operand.vmem [shape: bf16[3,64,128], index: 4, kind: input, shape index: {}]   ;;  %s1538_s0 = inlined_call_operand.vmem [shape: bf16[64,64], index: 0, kind: input, shape index: {}]   ;;  %s1539_s3 = inlined_call_operand.vmem [shape: f32[64,64], index: 3, kind: input, shape index: {}]   ;;  %s1540_s5 = inlined_call_operand.vmem [shape: f32[1,64,64], index: 5, kind: input, shape index: {}]   ;;  %s1541_s2 = inlined_call_operand.vmem [shape: f32[64,64], index: 2, kind: input, shape index: {}]   ;;  %s1542_s6 = inlined_call_operand.vmem [shape: f32[3,64,128], index: 6, kind: output, shape index: {0}]   ;;  %s1543_s7 = inlined_call_operand.vmem [shape: f32[1,64,64], index: 7, kind: output, shape index: {1}]  }
   0x1   :  { %v1191_v0 = vld [vmem:[%s1536_s1 + $0x38] sm:$0xff]   ;;  %v1192_v1 = vld [vmem:[%s1536_s1 + $0x30] sm:$0xff]   ;;  %v1193_v2 = vld [vmem:[%s1536_s1 + $0x28] sm:$0xff]  }
   0x2   :  { %1031 = vmatprep.subr.bf16.mxu0 %v1191_v0  ;;  %v1194_v3 = vld [vmem:[%s1536_s1 + $0x20] sm:$0xff]   ;;  %v1195_v5 = vld [vmem:[%s1536_s1 + $0x18] sm:$0xff]   ;;  %v1196_v6 = vld [vmem:[%s1536_s1 + $0x10] sm:$0xff]  }
   0x3   :  { %1032 = vmatpush3.bf16.msra.mxu0 %v1191_v0  ;;  %v1199_v4 = vld [vmem:[%s1537_s4] sm:$0xff]   ;;  %v1197_v7 = vld [vmem:[%s1536_s1 + $0x8] sm:$0xff]   ;;  %v1201_v10 = vld [vmem:[%s1537_s4 + $0x10] sm:$0xff]  }
   0x4   :  { %1033 = vmatprep.subr.bf16.mxu0 %v1192_v1  ;;  %1047 = vmatprep.mubr.bf16.mxu0 %v1199_v4  ;;  %v1198_v8 = vld [vmem:[%s1536_s1] sm:$0xff]   ;;  %v1200_v9 = vld [vmem:[%s1537_s4 + $0x8] sm:$0xff]   ;;  %v1202_v11 = vld [vmem:[%s1537_s4 + $0x18] sm:$0xff]  }
   0x5   :  { %v1203_v12 = vld [vmem:[%s1537_s4 + $0x20] sm:$0xff]   ;;  %v1204_v13 = vld [vmem:[%s1537_s4 + $0x28] sm:$0xff]   ;;  %v1205_v14 = vld [vmem:[%s1537_s4 + $0x30] sm:$0xff]  }
   0x6   :  { %v1206_v15 = vld [vmem:[%s1537_s4 + $0x38] sm:$0xff]   ;;  %v1207_v16 = vld [vmem:[%s1537_s4 + $0x40] sm:$0xff]   ;;  %v1208_v17 = vld [vmem:[%s1537_s4 + $0x48] sm:$0xff]  }
   0x7   :  { %1034 = vmatpush3.bf16.msra.mxu0 %v1192_v1  ;;  %v1209_v18 = vld [vmem:[%s1537_s4 + $0x50] sm:$0xff]   ;;  %v1210_v19 = vld [vmem:[%s1537_s4 + $0x58] sm:$0xff]   ;;  %v1318_v20 = vld [vmem:[%s1538_s0] sm:$0xff]  }
   0x8   :  { %1035 = vmatprep.subr.bf16.mxu0 %v1193_v2  ;;  %1079 = vmatprep.mubr.msk.bf16.mxu1 %vm355_vm0, %v1318_v20  ;;  %v1212_v39 = vld [vmem:[%s1538_s0 + $0x8] sm:$0xff]   ;;  %v1213_v41 = vld [vmem:[%s1538_s0 + $0x10] sm:$0xff]   ;;  %v1214_v48 = vld [vmem:[%s1538_s0 + $0x18] sm:$0xff]  }
   0x9   :  { %v604_v60 = vld [vmem:[%s1539_s3 + $0x38] sm:$0xff]  ;;  %v603_v61 = vld [vmem:[%s1539_s3 + $0x30] sm:$0xff]  ;;  %v602_v62 = vld [vmem:[%s1539_s3 + $0x28] sm:$0xff] }
   0xa   :  { %v601_v63 = vld [vmem:[%s1539_s3 + $0x20] sm:$0xff]  ;;  %v600_v0 = vld [vmem:[%s1539_s3 + $0x18] sm:$0xff] }
   0xb   :  { %1036 = vmatpush3.bf16.msra.mxu0 %v1193_v2  ;;  %v589_v1 = vld [vmem:[%s1540_s5] sm:$0xff]  ;;  %v599_v2 = vld [vmem:[%s1539_s3 + $0x10] sm:$0xff] }
   0xc   :  { %1037 = vmatprep.subr.bf16.mxu0 %v1194_v3  ;;  %v597_v4 = vld [vmem:[%s1539_s3] sm:$0xff] }
   0xf   :  { %1038 = vmatpush3.bf16.msra.mxu0 %v1194_v3  ;;  %v598_v3 = vld [vmem:[%s1539_s3 + $0x8] sm:$0xff] }
  0x10   :  { %1039 = vmatprep.subr.bf16.mxu0 %v1195_v5 }
  0x13   :  { %1040 = vmatpush3.bf16.msra.mxu0 %v1195_v5  ;;  %v590_v5 = vld [vmem:[%s1540_s5 + $0x8] sm:$0xff] }
  0x14   :  { %1041 = vmatprep.subr.bf16.mxu0 %v1196_v6 }
  0x17   :  { %1042 = vmatpush3.bf16.msra.mxu0 %v1196_v6  ;;  %v591_v6 = vld [vmem:[%s1540_s5 + $0x10] sm:$0xff] }
  0x18   :  { %1043 = vmatprep.subr.bf16.mxu0 %v1197_v7 }
  0x1b   :  { %1044 = vmatpush3.bf16.msra.mxu0 %v1197_v7  ;;  %v592_v7 = vld [vmem:[%s1540_s5 + $0x18] sm:$0xff] }
  0x1c   :  { %1045 = vmatprep.subr.bf16.mxu0 %v1198_v8 }
  0x1f   :  { %1046 = vmatpush3.bf16.msra.mxu0 %v1198_v8  ;;  %v593_v8 = vld [vmem:[%s1540_s5 + $0x20] sm:$0xff] }
  0x22   :  { %1048 = vmatmul.mubr.bf16.vlgmr.msra.gmra.mxu0 %v1200_v9  ;;  %v594_v9 = vld [vmem:[%s1540_s5 + $0x28] sm:$0xff] }
  0x23   :  { %1051 = vmatprep.mubr.bf16.mxu0 %v1201_v10  ;;  %v595_v10 = vld [vmem:[%s1540_s5 + $0x30] sm:$0xff] }
  0x2a   :  { %1052 = vmatmul.mubr.bf16.gmra.mxu0 %v1202_v11  ;;  %v596_v11 = vld [vmem:[%s1540_s5 + $0x38] sm:$0xff] }
  0x2b   :  { %1055 = vmatprep.mubr.bf16.mxu0 %v1203_v12  ;;  %v734_v12 = vld [vmem:[%s1541_s2] sm:$0xff] }
  0x32   :  { %1056 = vmatmul.mubr.bf16.gmra.mxu0 %v1204_v13  ;;  %v738_v13 = vld [vmem:[%s1541_s2 + $0x20] sm:$0xff] }
  0x33   :  { %1059 = vmatprep.mubr.bf16.mxu0 %v1205_v14 }
  0x3a   :  { %1060 = vmatmul.mubr.bf16.gmra.mxu0 %v1206_v15 }
  0x3b   :  { %1063 = vmatprep.mubr.bf16.mxu0 %v1207_v16 }
  0x42   :  { %1064 = vmatmul.mubr.bf16.gmra.mxu0 %v1208_v17 }
  0x43   :  { %1067 = vmatprep.mubr.bf16.mxu0 %v1209_v18 }
  0x4a   :  { %1068 = vmatmul.mubr.bf16.gmra.mxu0 %v1210_v19 }
  0x4b   :  { %1163 = vmatprep.mubr.msk.f32.mxu0 %vm355_vm0, %v734_v12 }
  0xe2   :  { %v1049_v21 = vpop.f32.mrf.mxu0 }
  0xe4   :  { %v220_v22 = vpop.f32.mrf.mxu0 }
  0xe6   :  { %v1050_v23 = vpop.f32.mrf.mxu0 }
  0xe7   :  { %v316_v33 = vpack.c.bf16 %v1050_v23, %v1049_v21 }
  0xe8   :  { %v223_v24 = vpop.f32.mrf.mxu0 }
  0xe9   :  { %v315_v36 = vpack.c.bf16 %v223_v24, %v220_v22 }
  0xea   :  { %v1053_v25 = vpop.f32.mrf.mxu0 }
  0xec   :  { %v236_v26 = vpop.f32.mrf.mxu0 }
  0xee   :  { %v1054_v27 = vpop.f32.mrf.mxu0 }
  0xef   :  { %v318_v28 = vpack.c.bf16 %v1054_v27, %v1053_v25 }
  0xf0   :  { %v239_v29 = vpop.f32.mrf.mxu0 }
  0xf1   :  { %v317_v30 = vpack.c.bf16 %v239_v29, %v236_v26  ;;  %1071 = vmatprep.subr.bf16.mxu1 %v318_v28 }
  0xf2   :  { %v1057_v31 = vpop.f32.mrf.mxu0  ;;  %1072 = vmatpush3.bf16.msra.mxu1 %v318_v28 }
  0xf3   :  { %1073 = vmatprep.subr.bf16.mxu1 %v317_v30 }
  0xf4   :  { %v252_v32 = vpop.f32.mrf.mxu0 }
  0xf6   :  { %v1058_v34 = vpop.f32.mrf.mxu0  ;;  %1074 = vmatpush3.bf16.msra.mxu1 %v317_v30 }
  0xf7   :  { %1075 = vmatprep.subr.bf16.mxu1 %v316_v33  ;;  %v320_v47 = vpack.c.bf16 %v1058_v34, %v1057_v31 }
  0xf8   :  { %v255_v35 = vpop.f32.mrf.mxu0 }
  0xf9   :  { %v319_v51 = vpack.c.bf16 %v255_v35, %v252_v32 }
  0xfa   :  { %v1061_v37 = vpop.f32.mrf.mxu0  ;;  %1076 = vmatpush3.bf16.msra.mxu1 %v316_v33 }
  0xfb   :  { %1077 = vmatprep.subr.bf16.mxu1 %v315_v36 }
  0xfc   :  { %v268_v38 = vpop.f32.mrf.mxu0 }
  0xfe   :  { %v1062_v40 = vpop.f32.mrf.mxu0  ;;  %1078 = vmatpush3.bf16.msra.mxu1 %v315_v36 }
  0xff   :  { %v322_v42 = vpack.c.bf16 %v1062_v40, %v1061_v37 }
 0x100   :  { %v271_v43 = vpop.f32.mrf.mxu0 }
 0x101   :  { %v321_v44 = vpack.c.bf16 %v271_v43, %v268_v38  ;;  %1080 = vmatmul.mubr.msk.bf16.vlgmr.msra.gmra.mxu1 %vm355_vm0, %v1212_v39  ;;  %1087 = vmatprep.subr.bf16.mxu1 %v322_v42 }
 0x102   :  { %v1065_v45 = vpop.f32.mrf.mxu0  ;;  %1088 = vmatpush3.bf16.msra.mxu1 %v322_v42  ;;  %1083 = vmatprep.mubr.msk.bf16.mxu1 %vm355_vm0, %v1213_v41 }
 0x103   :  { %1089 = vmatprep.subr.bf16.mxu1 %v321_v44 }
 0x104   :  { %v284_v46 = vpop.f32.mrf.mxu0 }
 0x106   :  { %v1066_v49 = vpop.f32.mrf.mxu0  ;;  %1090 = vmatpush3.bf16.msra.mxu1 %v321_v44 }
 0x107   :  { %1091 = vmatprep.subr.bf16.mxu1 %v320_v47  ;;  %v324_v58 = vpack.c.bf16 %v1066_v49, %v1065_v45  ;;  %v740_v49 = vld [vmem:[%s1541_s2 + $0x30] sm:$0xff] }
 0x108   :  { %v287_v50 = vpop.f32.mrf.mxu0 }
 0x109   :  { %1084 = vmatmul.mubr.msk.bf16.gmra.mxu1 %vm355_vm0, %v1214_v48  ;;  %v323_v59 = vpack.c.bf16 %v287_v50, %v284_v46  ;;  %v735_v46 = vld [vmem:[%s1541_s2 + $0x8] sm:$0xff]  ;;  %v737_v50 = vld [vmem:[%s1541_s2 + $0x18] sm:$0xff] }
 0x10a   :  { %v1069_v52 = vpop.f32.mrf.mxu0  ;;  %1092 = vmatpush3.bf16.msra.mxu1 %v320_v47  ;;  %1095 = vmatprep.mubr.msk.bf16.mxu1 %vm355_vm0, %v1318_v20  ;;  %v739_v47 = vld [vmem:[%s1541_s2 + $0x28] sm:$0xff] }
 0x10b   :  { %1093 = vmatprep.subr.bf16.mxu1 %v319_v51 }
 0x10c   :  { %v300_v53 = vpop.f32.mrf.mxu0 }
 0x10e   :  { %v1070_v54 = vpop.f32.mrf.mxu0  ;;  %1094 = vmatpush3.bf16.msra.mxu1 %v319_v51  ;;  %v741_v51 = vld [vmem:[%s1541_s2 + $0x38] sm:$0xff] }
 0x10f   :  { %v326_v55 = vpack.c.bf16 %v1070_v54, %v1069_v52 }
 0x110   :  { %v303_v56 = vpop.f32.mrf.mxu0 }
 0x111   :  { %v325_v57 = vpack.c.bf16 %v303_v56, %v300_v53  ;;  %1096 = vmatmul.mubr.msk.bf16.vlgmr.msra.gmra.mxu1 %vm355_vm0, %v1212_v39  ;;  %1103 = vmatprep.subr.bf16.mxu1 %v326_v55 }
 0x112   :  { %1104 = vmatpush3.bf16.msra.mxu1 %v326_v55  ;;  %1099 = vmatprep.mubr.msk.bf16.mxu1 %vm355_vm0, %v1213_v41 }
 0x113   :  { %1105 = vmatprep.subr.bf16.mxu1 %v325_v57 }
 0x116   :  { %1106 = vmatpush3.bf16.msra.mxu1 %v325_v57 }
 0x117   :  { %1107 = vmatprep.subr.bf16.mxu1 %v324_v58 }
 0x119   :  { %1100 = vmatmul.mubr.msk.bf16.gmra.mxu1 %vm355_vm0, %v1214_v48 }
 0x11a   :  { %1108 = vmatpush3.bf16.msra.mxu1 %v324_v58  ;;  %1111 = vmatprep.mubr.msk.bf16.mxu1 %vm355_vm0, %v1318_v20 }
 0x11b   :  { %1109 = vmatprep.subr.bf16.mxu1 %v323_v59 }
 0x11e   :  { %1110 = vmatpush3.bf16.msra.mxu1 %v323_v59 }
 0x11f   :  { %1119 = vmatprep.subr.mxu1 %v604_v60 }
 0x121   :  { %1112 = vmatmul.mubr.msk.bf16.vlgmr.msra.gmra.mxu1 %vm355_vm0, %v1212_v39 }
 0x122   :  { %1120 = vmatpush3.msra.mxu1 %v604_v60  ;;  %1115 = vmatprep.mubr.msk.bf16.mxu1 %vm355_vm0, %v1213_v41 }
 0x123   :  { %1121 = vmatprep.subr.mxu1 %v603_v61 }
 0x124   :  { %1122 = vmatpush3.msra.mxu1 %v603_v61 }
 0x125   :  { %1123 = vmatprep.subr.mxu1 %v602_v62 }
 0x126   :  { %1124 = vmatpush3.msra.mxu1 %v602_v62 }
 0x127   :  { %1125 = vmatprep.subr.mxu1 %v601_v63 }
 0x128   :  { %1126 = vmatpush3.msra.mxu1 %v601_v63 }
 0x129   :  { %1116 = vmatmul.mubr.msk.bf16.gmra.mxu1 %vm355_vm0, %v1214_v48  ;;  %1127 = vmatprep.subr.mxu1 %v600_v0  ;;  %v736_v48 = vld [vmem:[%s1541_s2 + $0x10] sm:$0xff] }
 0x12a   :  { %1128 = vmatpush3.msra.mxu1 %v600_v0  ;;  %1135 = vmatprep.mubr.msk.f32.mxu1 %vm355_vm0, %v589_v1 }
 0x12b   :  { %1129 = vmatprep.subr.mxu1 %v599_v2 }
 0x12c   :  { %1130 = vmatpush3.msra.mxu1 %v599_v2 }
 0x12d   :  { %1131 = vmatprep.subr.mxu1 %v598_v3 }
 0x12e   :  { %1132 = vmatpush3.msra.mxu1 %v598_v3 }
 0x12f   :  { %1133 = vmatprep.subr.mxu1 %v597_v4 }
 0x130   :  { %1134 = vmatpush3.msra.mxu1 %v597_v4 }
 0x131   :  { %1136 = vmatmul.mubr.msk.f32.vlgmr.msra.gmra.mxu1 %vm355_vm0, %v590_v5 }
 0x132   :  { %1138 = vmatprep.mubr.msk.f32.mxu1 %vm355_vm0, %v591_v6 }
 0x135   :  { %1139 = vmatmul.mubr.msk.f32.gmra.mxu1 %vm355_vm0, %v592_v7 }
 0x136   :  { %1141 = vmatprep.mubr.msk.f32.mxu1 %vm355_vm0, %v593_v8 }
 0x139   :  { %1142 = vmatmul.mubr.msk.f32.gmra.mxu1 %vm355_vm0, %v594_v9 }
 0x13a   :  { %1144 = vmatprep.mubr.msk.f32.mxu1 %vm355_vm0, %v595_v10 }
 0x13d   :  { %1145 = vmatmul.mubr.msk.f32.gmra.mxu1 %vm355_vm0, %v596_v11 }
 0x13e   :  { %1169 = vmatprep.mubr.msk.f32.mxu1 %vm355_vm0, %v738_v13 }
 0x1c1   :  { %v1081_v14 = vpop.f32.mrf.mxu1 }
 0x1c2   :  { %435 = vst [vmem:[%s1542_s6 + $0x10] sm:$0xff] %v1081_v14 }
 0x1c3   :  { %v402_v15 = vpop.f32.mrf.mxu1 }
 0x1c4   :  { %433 = vst [vmem:[%s1542_s6] sm:$0xff] %v402_v15 }
 0x1c5   :  { %v1082_v16 = vpop.f32.mrf.mxu1 }
 0x1c6   :  { %436 = vst [vmem:[%s1542_s6 + $0x18] sm:$0xff] %v1082_v16 }
 0x1c7   :  { %v405_v17 = vpop.f32.mrf.mxu1 }
 0x1c8   :  { %434 = vst [vmem:[%s1542_s6 + $0x8] sm:$0xff] %v405_v17 }
 0x1c9   :  { %v1085_v18 = vpop.f32.mrf.mxu1 }
 0x1ca   :  { %439 = vst [vmem:[%s1542_s6 + $0x30] sm:$0xff] %v1085_v18 }
 0x1cb   :  { %v418_v19 = vpop.f32.mrf.mxu1 }
 0x1cc   :  { %437 = vst [vmem:[%s1542_s6 + $0x20] sm:$0xff] %v418_v19 }
 0x1cd   :  { %v1086_v20 = vpop.f32.mrf.mxu1 }
 0x1ce   :  { %440 = vst [vmem:[%s1542_s6 + $0x38] sm:$0xff] %v1086_v20 }
 0x1cf   :  { %v421_v21 = vpop.f32.mrf.mxu1 }
 0x1d0   :  { %438 = vst [vmem:[%s1542_s6 + $0x28] sm:$0xff] %v421_v21 }
 0x1d1   :  { %v1097_v22 = vpop.f32.mrf.mxu1 }
 0x1d2   :  { %921 = vst [vmem:[%s1542_s6 + $0x50] sm:$0xff] %v1097_v22 }
 0x1d3   :  { %v475_v23 = vpop.f32.mrf.mxu1 }
 0x1d4   :  { %919 = vst [vmem:[%s1542_s6 + $0x40] sm:$0xff] %v475_v23 }
 0x1d5   :  { %v1098_v24 = vpop.f32.mrf.mxu1 }
 0x1d6   :  { %922 = vst [vmem:[%s1542_s6 + $0x58] sm:$0xff] %v1098_v24 }
 0x1d7   :  { %v478_v25 = vpop.f32.mrf.mxu1 }
 0x1d8   :  { %920 = vst [vmem:[%s1542_s6 + $0x48] sm:$0xff] %v478_v25 }
 0x1d9   :  { %v1101_v26 = vpop.f32.mrf.mxu1 }
 0x1da   :  { %925 = vst [vmem:[%s1542_s6 + $0x70] sm:$0xff] %v1101_v26 }
 0x1db   :  { %v491_v27 = vpop.f32.mrf.mxu1 }
 0x1dc   :  { %923 = vst [vmem:[%s1542_s6 + $0x60] sm:$0xff] %v491_v27 }
 0x1dd   :  { %v1102_v28 = vpop.f32.mrf.mxu1 }
 0x1de   :  { %926 = vst [vmem:[%s1542_s6 + $0x78] sm:$0xff] %v1102_v28 }
 0x1df   :  { %v494_v29 = vpop.f32.mrf.mxu1 }
 0x1e0   :  { %924 = vst [vmem:[%s1542_s6 + $0x68] sm:$0xff] %v494_v29 }
 0x1e1   :  { %v1113_v30 = vpop.f32.mrf.mxu1 }
 0x1e2   :  { %933 = vst [vmem:[%s1542_s6 + $0x90] sm:$0xff] %v1113_v30 }
 0x1e3   :  { %v549_v31 = vpop.f32.mrf.mxu1 }
 0x1e4   :  { %931 = vst [vmem:[%s1542_s6 + $0x80] sm:$0xff] %v549_v31 }
 0x1e5   :  { %v1114_v32 = vpop.f32.mrf.mxu1 }
 0x1e6   :  { %934 = vst [vmem:[%s1542_s6 + $0x98] sm:$0xff] %v1114_v32 }
 0x1e7   :  { %v552_v33 = vpop.f32.mrf.mxu1 }
 0x1e8   :  { %932 = vst [vmem:[%s1542_s6 + $0x88] sm:$0xff] %v552_v33 }
 0x1e9   :  { %v1117_v34 = vpop.f32.mrf.mxu1 }
 0x1ea   :  { %937 = vst [vmem:[%s1542_s6 + $0xb0] sm:$0xff] %v1117_v34 }
 0x1eb   :  { %v565_v35 = vpop.f32.mrf.mxu1 }
 0x1ec   :  { %935 = vst [vmem:[%s1542_s6 + $0xa0] sm:$0xff] %v565_v35 }
 0x1ed   :  { %v1118_v36 = vpop.f32.mrf.mxu1 }
 0x1ee   :  { %938 = vst [vmem:[%s1542_s6 + $0xb8] sm:$0xff] %v1118_v36 }
 0x1ef   :  { %v568_v37 = vpop.f32.mrf.mxu1 }
 0x1f0   :  { %936 = vst [vmem:[%s1542_s6 + $0xa8] sm:$0xff] %v568_v37 }
 0x1f1   :  { %v1137_v38 = vpop.f32.mrf.mxu1 }
 0x1f3   :  { %v695_v39 = vpop.f32.mrf.mxu1 }
 0x1f5   :  { %v1140_v40 = vpop.f32.mrf.mxu1 }
 0x1f7   :  { %v705_v41 = vpop.f32.mrf.mxu1 }
 0x1f9   :  { %v1143_v42 = vpop.f32.mrf.mxu1 }
 0x1fb   :  { %v715_v43 = vpop.f32.mrf.mxu1 }
 0x1fd   :  { %v1146_v44 = vpop.f32.mrf.mxu1 }
 0x1fe   :  { %1147 = vmatprep.subr.mxu0 %v1146_v44  ;;  %1175 = vmatprep.subr.mxu1 %v1146_v44 }
 0x1ff   :  { %v725_v45 = vpop.f32.mrf.mxu1  ;;  %1148 = vmatpush3.msra.mxu0 %v1146_v44  ;;  %1183 = vmatpush3.msra.mxu1 %v1146_v44 }
 0x200   :  { %1149 = vmatprep.subr.mxu0 %v725_v45  ;;  %1176 = vmatprep.subr.mxu1 %v725_v45 }
 0x201   :  { %1150 = vmatpush3.msra.mxu0 %v725_v45  ;;  %1184 = vmatpush3.msra.mxu1 %v725_v45 }
 0x202   :  { %1151 = vmatprep.subr.mxu0 %v1143_v42  ;;  %1177 = vmatprep.subr.mxu1 %v1143_v42 }
 0x203   :  { %1152 = vmatpush3.msra.mxu0 %v1143_v42  ;;  %1185 = vmatpush3.msra.mxu1 %v1143_v42 }
 0x204   :  { %1153 = vmatprep.subr.mxu0 %v715_v43  ;;  %1178 = vmatprep.subr.mxu1 %v715_v43 }
 0x205   :  { %1154 = vmatpush3.msra.mxu0 %v715_v43  ;;  %1186 = vmatpush3.msra.mxu1 %v715_v43 }
 0x206   :  { %1155 = vmatprep.subr.mxu0 %v1140_v40  ;;  %1179 = vmatprep.subr.mxu1 %v1140_v40 }
 0x207   :  { %1156 = vmatpush3.msra.mxu0 %v1140_v40  ;;  %1187 = vmatpush3.msra.mxu1 %v1140_v40 }
 0x208   :  { %1157 = vmatprep.subr.mxu0 %v705_v41  ;;  %1180 = vmatprep.subr.mxu1 %v705_v41 }
 0x209   :  { %1158 = vmatpush3.msra.mxu0 %v705_v41  ;;  %1188 = vmatpush3.msra.mxu1 %v705_v41 }
 0x20a   :  { %1159 = vmatprep.subr.mxu0 %v1137_v38  ;;  %1181 = vmatprep.subr.mxu1 %v1137_v38 }
 0x20b   :  { %1160 = vmatpush3.msra.mxu0 %v1137_v38  ;;  %1189 = vmatpush3.msra.mxu1 %v1137_v38 }
 0x20c   :  { %1161 = vmatprep.subr.mxu0 %v695_v39  ;;  %1182 = vmatprep.subr.mxu1 %v695_v39 }
 0x20d   :  { %1162 = vmatpush3.msra.mxu0 %v695_v39  ;;  %1190 = vmatpush3.msra.mxu1 %v695_v39 }
 0x20e   :  { %1164 = vmatmul.mubr.msk.f32.vlgmr.msra.gmra.mxu0 %vm355_vm0, %v735_v46  ;;  %1170 = vmatmul.mubr.msk.f32.vlgmr.msra.gmra.mxu1 %vm355_vm0, %v739_v47 }
 0x20f   :  { %1166 = vmatprep.mubr.msk.f32.mxu0 %vm355_vm0, %v736_v48  ;;  %1172 = vmatprep.mubr.msk.f32.mxu1 %vm355_vm0, %v740_v49 }
 0x212   :  { %1167 = vmatmul.mubr.msk.f32.gmra.mxu0 %vm355_vm0, %v737_v50  ;;  %1173 = vmatmul.mubr.msk.f32.gmra.mxu1 %vm355_vm0, %v741_v51 }
 0x2ce   :  { %v1165_v52 = vpop.f32.mrf.mxu0  ;;  %v1171_v53 = vpop.f32.mrf.mxu1 }
 0x2cf   :  { %872 = vst.msk [vmem:[%s1543_s7 + $0x8] sm:$0xff] %vm355_vm0, %v1165_v52  ;;  %876 = vst.msk [vmem:[%s1543_s7 + $0x28] sm:$0xff] %vm355_vm0, %v1171_v53 }
 0x2d0   :  { %v832_v54 = vpop.f32.mrf.mxu0  ;;  %v852_v55 = vpop.f32.mrf.mxu1 }
 0x2d1   :  { %871 = vst.msk [vmem:[%s1543_s7] sm:$0xff] %vm355_vm0, %v832_v54  ;;  %875 = vst.msk [vmem:[%s1543_s7 + $0x20] sm:$0xff] %vm355_vm0, %v852_v55 }
 0x2d2   :  { %v1168_v56 = vpop.f32.mrf.mxu0  ;;  %v1174_v57 = vpop.f32.mrf.mxu1 }
 0x2d3   :  { %874 = vst.msk [vmem:[%s1543_s7 + $0x18] sm:$0xff] %vm355_vm0, %v1168_v56  ;;  %878 = vst.msk [vmem:[%s1543_s7 + $0x38] sm:$0xff] %vm355_vm0, %v1174_v57 }
 0x2d4   :  { %v842_v58 = vpop.f32.mrf.mxu0  ;;  %v862_v59 = vpop.f32.mrf.mxu1 }
 0x2d5   :  { %873 = vst.msk [vmem:[%s1543_s7 + $0x10] sm:$0xff] %vm355_vm0, %v842_v58  ;;  %877 = vst.msk [vmem:[%s1543_s7 + $0x30] sm:$0xff] %vm355_vm0, %v862_v59 }

</bundles_post_ra>
